<compile_context>
chip_gen: v6e
topology: v6e:2x2x1
jax: 0.10.0
libtpu: 0.0.40
codegen_flags: <defaults>
</compile_context>

<pallas_src>
import jax
import jax.numpy as jnp
import numpy as np
from jax.experimental import pallas as pl
from jax.experimental.pallas import tpu as pltpu


# conv hyper-parameters fixed by the PyTorch module
KH, KW = 3, 5          # conv1 kernel (conv2 kernel width == KW)
SH, SW = 2, 3          # strides      (conv2 stride      == SW)
PH, PW = 1, 2          # paddings     (conv2 padding     == PW)


def _round_up(v, m):
    return ((v + m - 1) // m) * m


def _make_kernel(C, TL, K, K_pad, num_tiles):
    """Fused in-VMEM im2col + relu(W @ patches) with bias folded in."""

    def fused_conv_kernel(x_ref, w_ref, o_ref, patches_ref):
        # x_ref:       (SW, C, Lx)      phase-decomposed, zero-padded input
        # w_ref:       (Cout_pad, K_pad) folded weight, last column = bias
        # o_ref:       (Cout_pad, TL)   lane-dense output tile
        # patches_ref: (K_pad, TL)      VMEM scratch for im2col patches
        if num_tiles == 1:
            base = 0                                   # fully static slices
        else:
            base = pl.multiple_of(pl.program_id(0) * TL, 128)

        # in-kernel im2col: KW contiguous (C, TL) copies, no HBM round trip.
        # patches[kw*C + c, l] = x_pad[n, c, j*SW + kw]   (l = n*Jb + j)
        for kw in range(KW):
            s, q = kw % SW, kw // SW
            patches_ref[kw * C:(kw + 1) * C, :] = x_ref[s, :, pl.ds(base + q, TL)]
        # ones row: bias folded into the MXU pass
        patches_ref[K:K_pad, :] = jnp.ones((K_pad - K, TL), jnp.float32)

        acc = jnp.dot(w_ref[...], patches_ref[...],
                      preferred_element_type=jnp.float32)
        o_ref[...] = jnp.maximum(acc, 0.0).astype(o_ref.dtype)

    return fused_conv_kernel


@jax.jit
def model_forward(x, w1, b1, w2, b2):
    N, C, H, W = x.shape
    Cout = w1.shape[0]
    assert H == 1, "v1 + v2 is only shape-consistent for H == 1"
    assert w1.shape == (Cout, C, KH, KW) and w2.shape == (Cout, C, KW)
    # fold validity: these exact constants force Ho == 1 and make conv1's
    # top/bottom kernel rows see only zero padding.
    assert KH == 3 and PH == 1 and SH == 2

    Wp = W + 2 * PW
    Ho = (H + 2 * PH - KH) // SH + 1
    Wo = (Wp - KW) // SW + 1
    assert Ho == 1

    # ---- fold the two convolutions (+ biases) into one 1-D conv -----------
    #   v1 + v2 == conv1d(x, w1[:, :, PH, :] + w2, b1 + b2)
    K = C * KW                           # 15
    K_pad = _round_up(K + 1, 8)          # +1 bias row -> 16
    assert K_pad == K + 1                # holds for C=3, KW=5
    Cout_pad = _round_up(Cout, 8)

    w_f = (w1[:, :, PH, :] + w2).astype(jnp.float32)           # (Cout, C, KW)
    w_f = jnp.transpose(w_f, (0, 2, 1)).reshape(Cout, K)       # col = kw*C + c
    b_f = (b1 + b2).astype(jnp.float32)
    w_p = jnp.zeros((Cout_pad, K_pad), jnp.float32)
    w_p = w_p.at[:Cout, :K].set(w_f).at[:Cout, K].set(b_f)

    # ---- phase-decomposed input (stride-SW conv -> contiguous slices) -----
    # x_strided[s, c, n*Jb + j] == x_padded[n, c, j*SW + s]
    Wp_r = _round_up(Wp, SW)
    Jb = Wp_r // SW                      # output columns computed per batch
    L = N * Jb                           # batch folded into the lane axis

    Lpad0 = _round_up(L, 128)
    TL = min(Lpad0, 512)                 # lane tile (>=128; >=512 when large)
    Lpad = _round_up(Lpad0, TL)
    num_tiles = Lpad // TL
    Lx = Lpad + 128                      # headroom for the in-kernel +1 shift

    xs = x[:, :, 0, :].astype(jnp.float32)                     # (N, C, W)
    xp = jnp.pad(xs, ((0, 0), (0, 0), (PW, Wp_r - W - PW)))    # (N, C, Wp_r)
    xr = xp.reshape(N, C, Jb, SW)
    x_strided = jnp.transpose(xr, (3, 1, 0, 2)).reshape(SW, C, L)
    x_strided = jnp.pad(x_strided, ((0, 0), (0, 0), (0, Lx - L)))

    kernel = _make_kernel(C, TL, K, K_pad, num_tiles)
    cost = pl.CostEstimate(
        flops=int(2 * Cout_pad * K_pad * Lpad),
        transcendentals=0,
        bytes_accessed=int(x_strided.size + w_p.size + Cout_pad * Lpad) * 4,
    )

    out = pl.pallas_call(
        kernel,
        out_shape=jax.ShapeDtypeStruct((Cout_pad, Lpad), jnp.float32),
        grid=(num_tiles,),
        in_specs=[
            pl.BlockSpec((SW, C, Lx), lambda t: (0, 0, 0)),       # whole x
            pl.BlockSpec((Cout_pad, K_pad), lambda t: (0, 0)),    # weight
        ],
        out_specs=pl.BlockSpec((Cout_pad, TL), lambda t: (0, t)),
        scratch_shapes=[pltpu.VMEM((K_pad, TL), jnp.float32)],
        compiler_params=pltpu.CompilerParams(
            dimension_semantics=(("parallel",) if num_tiles > 1
                                 else ("arbitrary",))),
        cost_estimate=cost,
    )(x_strided, w_p)

    # strip lane padding / garbage tail columns, restore NCHW: (N, Cout, 1, Wo)
    res = out[:Cout, :L].reshape(Cout, N, Jb)[:, :, :Wo]
    return jnp.transpose(res, (1, 0, 2))[:, :, None, :]


# ---------------------------------------------------------------------------
if __name__ == "__main__":
    key = jax.random.PRNGKey(0)
    kx, k1, k2, k3, k4 = jax.random.split(key, 5)

    # small input consistent with the module (H = 1 so the add is well-defined)
    x = jax.random.normal(kx, (2, 3, 1, 32), dtype=jnp.float32)

    # deterministic parameter init (PyTorch-style uniform bounds)
    fan1 = 3 * 3 * 5
    fan2 = 3 * 5
    w1 = jax.random.uniform(k1, (4, 3, 3, 5), jnp.float32,
                            -1.0 / np.sqrt(fan1), 1.0 / np.sqrt(fan1))
    b1 = jax.random.uniform(k2, (4,), jnp.float32,
                            -1.0 / np.sqrt(fan1), 1.0 / np.sqrt(fan1))
    w2 = jax.random.uniform(k3, (4, 3, 5), jnp.float32,
                            -1.0 / np.sqrt(fan2), 1.0 / np.sqrt(fan2))
    b2 = jax.random.uniform(k4, (4,), jnp.float32,
                            -1.0 / np.sqrt(fan2), 1.0 / np.sqrt(fan2))

    out = jax.block_until_ready(model_forward(x, w1, b1, w2, b2))

    # reference check with XLA convolutions (un-folded semantics)
    v1_ref = jax.lax.conv_general_dilated(
        x, w1, window_strides=(SH, SW), padding=[(PH, PH), (PW, PW)],
        dimension_numbers=("NCHW", "OIHW", "NCHW")) + b1[None, :, None, None]
    xs = x[:, :, 0, :]
    v2_ref = jax.lax.conv_general_dilated(
        xs, w2, window_strides=(SW,), padding=[(PW, PW)],
        dimension_numbers=("NCH", "OIH", "NCH")) + b2[None, :, None]
    ref = jnp.maximum(v1_ref + v2_ref[:, :, None, :], 0.0)

    np.testing.assert_allclose(np.asarray(out), np.asarray(ref),
                               rtol=1e-4, atol=1e-4)
    print("KERNEL_OK")
</pallas_src>

<mosaic_0001>
module attributes {stable_mosaic.version = 11 : i64} {
  func.func @fused_conv_kernel(%arg0: i32, %arg1: memref<3x3x256xf32, #tpu.memory_space<vmem>>, %arg2: memref<8x16xf32, #tpu.memory_space<vmem>>, %arg3: memref<8x128xf32, #tpu.memory_space<vmem>>, %arg4: memref<16x128xf32, #tpu.memory_space<vmem>>) attributes {dimension_semantics = [#tpu.dimension_semantics<arbitrary>], iteration_bounds = array<i64: 1>, scalar_prefetch = 0 : i64, scratch_operands = 1 : i64, tpu.core_type = #tpu.core_type<tc>, window_params = [{pipeline_mode = #tpu.pipeline_mode<synchronous>, transform_indices = @transform_0, window_bounds = array<i64: 3, 3, 256>}, {pipeline_mode = #tpu.pipeline_mode<synchronous>, transform_indices = @transform_1, window_bounds = array<i64: 8, 16>}, {transform_indices = @transform_2, window_bounds = array<i64: 8, 128>}]} {
    %c0 = arith.constant 0 : index
    %c0_0 = arith.constant 0 : index
    %c0_1 = arith.constant 0 : index
    %0 = vector.load %arg1[%c0, %c0_0, %c0_1] : memref<3x3x256xf32, #tpu.memory_space<vmem>>, vector<1x3x128xf32>
    %1 = vector.shape_cast %0 : vector<1x3x128xf32> to vector<3x128xf32>
    %c0_2 = arith.constant 0 : index
    %c0_3 = arith.constant 0 : index
    %2 = vector.load %arg4[%c0_2, %c0_3] : memref<16x128xf32, #tpu.memory_space<vmem>>, vector<3x128xf32>
    tpu.vector_store %arg4[%c0_2, %c0_3], %1 {strides = array<i32>} : memref<16x128xf32, #tpu.memory_space<vmem>>, vector<3x128xf32>,
    %c1 = arith.constant 1 : index
    %c0_4 = arith.constant 0 : index
    %c0_5 = arith.constant 0 : index
    %3 = vector.load %arg1[%c1, %c0_4, %c0_5] : memref<3x3x256xf32, #tpu.memory_space<vmem>>, vector<1x3x128xf32>
    %4 = vector.shape_cast %3 : vector<1x3x128xf32> to vector<3x128xf32>
    %c3 = arith.constant 3 : index
    %c0_6 = arith.constant 0 : index
    %5 = vector.load %arg4[%c3, %c0_6] : memref<16x128xf32, #tpu.memory_space<vmem>>, vector<3x128xf32>
    tpu.vector_store %arg4[%c3, %c0_6], %4 {strides = array<i32>} : memref<16x128xf32, #tpu.memory_space<vmem>>, vector<3x128xf32>,
    %c2 = arith.constant 2 : index
    %c0_7 = arith.constant 0 : index
    %c0_8 = arith.constant 0 : index
    %6 = vector.load %arg1[%c2, %c0_7, %c0_8] : memref<3x3x256xf32, #tpu.memory_space<vmem>>, vector<1x3x128xf32>
    %7 = vector.shape_cast %6 : vector<1x3x128xf32> to vector<3x128xf32>
    %c6 = arith.constant 6 : index
    %c0_9 = arith.constant 0 : index
    %8 = vector.load %arg4[%c6, %c0_9] : memref<16x128xf32, #tpu.memory_space<vmem>>, vector<3x128xf32>
    tpu.vector_store %arg4[%c6, %c0_9], %7 {strides = array<i32>} : memref<16x128xf32, #tpu.memory_space<vmem>>, vector<3x128xf32>,
    %c0_10 = arith.constant 0 : index
    %c0_11 = arith.constant 0 : index
    %c1_12 = arith.constant 1 : index
    %9 = vector.load %arg1[%c0_10, %c0_11, %c1_12] : memref<3x3x256xf32, #tpu.memory_space<vmem>>, vector<1x3x128xf32>
    %10 = vector.shape_cast %9 : vector<1x3x128xf32> to vector<3x128xf32>
    %c9 = arith.constant 9 : index
    %c0_13 = arith.constant 0 : index
    %11 = vector.load %arg4[%c9, %c0_13] : memref<16x128xf32, #tpu.memory_space<vmem>>, vector<3x128xf32>
    tpu.vector_store %arg4[%c9, %c0_13], %10 {strides = array<i32>} : memref<16x128xf32, #tpu.memory_space<vmem>>, vector<3x128xf32>,
    %c1_14 = arith.constant 1 : index
    %c0_15 = arith.constant 0 : index
    %c1_16 = arith.constant 1 : index
    %12 = vector.load %arg1[%c1_14, %c0_15, %c1_16] : memref<3x3x256xf32, #tpu.memory_space<vmem>>, vector<1x3x128xf32>
    %13 = vector.shape_cast %12 : vector<1x3x128xf32> to vector<3x128xf32>
    %c12 = arith.constant 12 : index
    %c0_17 = arith.constant 0 : index
    %14 = vector.load %arg4[%c12, %c0_17] : memref<16x128xf32, #tpu.memory_space<vmem>>, vector<3x128xf32>
    tpu.vector_store %arg4[%c12, %c0_17], %13 {strides = array<i32>} : memref<16x128xf32, #tpu.memory_space<vmem>>, vector<3x128xf32>,
    %cst = arith.constant 1.000000e+00 : f32
    %15 = vector.broadcast %cst : f32 to vector<1x128xf32>
    %c15 = arith.constant 15 : index
    %c0_18 = arith.constant 0 : index
    %16 = vector.load %arg4[%c15, %c0_18] : memref<16x128xf32, #tpu.memory_space<vmem>>, vector<1x128xf32>
    tpu.vector_store %arg4[%c15, %c0_18], %15 {strides = array<i32>} : memref<16x128xf32, #tpu.memory_space<vmem>>, vector<1x128xf32>,
    %c0_19 = arith.constant 0 : index
    %c0_20 = arith.constant 0 : index
    %17 = vector.load %arg2[%c0_19, %c0_20] : memref<8x16xf32, #tpu.memory_space<vmem>>, vector<8x16xf32>
    %c0_21 = arith.constant 0 : index
    %c0_22 = arith.constant 0 : index
    %18 = vector.load %arg4[%c0_21, %c0_22] : memref<16x128xf32, #tpu.memory_space<vmem>>, vector<16x128xf32>
    %cst_23 = arith.constant dense<0.000000e+00> : vector<8x128xf32>
    %19 = tpu.matmul %17, %18, %cst_23 {dimension_numbers = #tpu.dot_dimension_numbers<[1], [0], [0], [1], [0, 0, 1, 1], [], []>} : vector<8x16xf32>, vector<16x128xf32>, vector<8x128xf32> -> vector<8x128xf32>
    %cst_24 = arith.constant 0.000000e+00 : f32
    %20 = vector.broadcast %cst_24 : f32 to vector<8x128xf32>
    %21 = arith.maximumf %19, %20 : vector<8x128xf32>
    %c0_25 = arith.constant 0 : index
    %c0_26 = arith.constant 0 : index
    %22 = vector.load %arg3[%c0_25, %c0_26] : memref<8x128xf32, #tpu.memory_space<vmem>>, vector<8x128xf32>
    tpu.vector_store %arg3[%c0_25, %c0_26], %21 {strides = array<i32>} : memref<8x128xf32, #tpu.memory_space<vmem>>, vector<8x128xf32>,
    return
  }
  func.func @transform_0(%arg0: i32) -> (i32, i32, i32) {
    %c0_i32 = arith.constant 0 : i32
    %c0_i32_0 = arith.constant 0 : i32
    %c0_i32_1 = arith.constant 0 : i32
    %c0_i32_2 = arith.constant 0 : i32
    return %c0_i32, %c0_i32_0, %c0_i32_1 : i32, i32, i32
  }
  func.func @transform_1(%arg0: i32) -> (i32, i32) {
    %c0_i32 = arith.constant 0 : i32
    %c0_i32_0 = arith.constant 0 : i32
    %c0_i32_1 = arith.constant 0 : i32
    return %c0_i32, %c0_i32_0 : i32, i32
  }
  func.func @transform_2(%arg0: i32) -> (i32, i32) {
    %c0_i32 = arith.constant 0 : i32
    %c0_i32_0 = arith.constant 0 : i32
    return %c0_i32, %arg0 : i32, i32
  }
}

</mosaic_0001>

<bundles_post_ra>
// kernel: model_forward.1
= control target key start
LH: loop header
LB: loop body
LE: loop exit
PB: predicated region body
PF: predicated region fallthrough
CT: control target
= control target key end

     0   :  { %v144_v3 = vmov 0.0   ;;  %v145_v4 = vmov 1.0   ;;  %s146_s15 = smov 127   ;;  %vm147_vm0 = vmmov 0   ;;  %vm26_vm1 = vcmask 1039360   ;;  %s184_s0 = inlined_call_operand.vmem [shape: f32[3,3,256], index: 0, kind: input, shape index: {}]   ;;  %s185_s1 = inlined_call_operand.vmem [shape: f32[8,16], index: 1, kind: input, shape index: {}]   ;;  %s186_s2 = inlined_call_operand.vmem [shape: f32[8,128], index: 2, kind: output, shape index: {}]  }
   0x1   :  { %v126_v0 = vld [vmem:[%s184_s0 + $0x8] sm:$0x77]  ;;  %v11_v1 = vld [vmem:[%s184_s0] sm:$0x7]  ;;  %131 = vmatprep.subr.mxu0 %v144_v3  ;;  %40 = vst [vmem:[#allocation2 + $0xf] sm:$0x1] %v145_v4  ;;  %135 = vmatprep.mubr.msk.f32.mxu0 %vm147_vm0, %v144_v3 }
   0x2   :  { %v124_v2 = vld [vmem:[%s184_s0 + $0x8] sm:$0x7]  ;;  %33 = vrot.lane.b32.xlu1 %v126_v0, %s146_s15  ;;  %12 = vst [vmem:[#allocation2] sm:$0x7] %v11_v1  ;;  %v125_v5 = vld [vmem:[%s184_s0 + $0x10] sm:$0x7]  ;;  %v32_v6 = vcombine.high %v126_v0, %v126_v0 }
   0x3   :  { %15 = vst [vmem:[#allocation2 + $0x3] sm:$0x7] %v124_v2  ;;  %v19_v7 = vld [vmem:[%s184_s0] sm:$0x77]  ;;  %18 = vst [vmem:[#allocation2 + $0x6] sm:$0x7] %v125_v5 }
   0x4   :  { %22 = vrot.lane.b32.xlu0 %v19_v7, %s146_s15  ;;  %v21_v8 = vcombine.high %v19_v7, %v19_v7  ;;  %v41_v17 = vld [vmem:[%s185_s1] sm:$0xff]  ;;  %vm44_vm2 = vcmask 130048  }
   0x6   :  { %35 = vrot.lane.b32.xlu1 %v32_v6, %s146_s15 }
   0x8   :  { %24 = vrot.lane.b32.xlu0 %v21_v8, %s146_s15 }
   0xa   :  { %v42_v16 = vld [vmem:[#allocation2] sm:$0xff] }
  0x74   :  { %v34_v9 = vpop.permute.xlu1 %33 }
  0x76   :  { %v23_v10 = vpop.permute.xlu0 %22 }
  0x78   :  { %v36_v11 = vpop.permute.xlu1 %35 }
  0x79   :  { %v37_v12 = vsel %vm26_vm1, %v34_v9, %v36_v11 }
  0x7a   :  { %v25_v13 = vpop.permute.xlu0 %24  ;;  %39 = vst [vmem:[#allocation2 + $0xc] sm:$0x7] %v37_v12 }
  0x7b   :  { %v27_v14 = vsel %vm26_vm1, %v23_v10, %v25_v13 }
  0x7c   :  { %29 = vst [vmem:[#allocation2 + $0x9] sm:$0x7] %v27_v14 }
  0x83   :  { %v43_v15 = vld [vmem:[#allocation2 + $0x8] sm:$0xff] }
  0x84   :  { %132 = vmatpush3.msra.mxu0 %v43_v15 }
  0x85   :  { %133 = vmatprep.subr.mxu0 %v144_v3 }
  0x86   :  { %134 = vmatpush3.msra.mxu0 %v42_v16 }
  0x87   :  { %136 = vmatmul.mubr.msk.f32.vlgmr.msra.gmra.mxu0 %vm44_vm2, %v41_v17 }
 0x147   :  { %v114_v18 = vpop.f32.mrf.mxu0 }
 0x148   :  { %v118_v19 = vmax.f32 %v114_v18, 0.0 }
 0x149   :  { %v137_v20 = vpop.f32.mrf.mxu0 }
 0x14a   :  { %119 = vst [vmem:[%s186_s2] sm:$0xff] %v118_v19 }

</bundles_post_ra>
